<compile_context>
chip_gen: v7x
topology: tpu7x:2x2x1
jax: 0.10.0
libtpu: 0.0.40
codegen_flags: <defaults>
</compile_context>

<pallas_src>
import math
import jax
import jax.numpy as jnp
from jax.experimental import pallas as pl
from jax.experimental.pallas import tpu as pltpu


def _round_up(a: int, b: int) -> int:
    return (a + b - 1) // b * b


def _geglu_kernel(x_ref, wv_ref, wg_ref, bv_ref, bg_ref, o_ref, accv, accg):
    # x_ref:  (tm, tk)      wv_ref/wg_ref: (tk, tn)
    # bv_ref/bg_ref: (1, tn)  o_ref: (tm, tn)
    # accv/accg: f32 VMEM accumulators (tm, tn)
    k = pl.program_id(2)

    @pl.when(k == 0)
    def _():
        accv[...] = jnp.zeros_like(accv)
        accg[...] = jnp.zeros_like(accg)

    x = x_ref[...]
    accv[...] += jnp.dot(x, wv_ref[...], preferred_element_type=jnp.float32)
    accg[...] += jnp.dot(x, wg_ref[...], preferred_element_type=jnp.float32)

    @pl.when(k == pl.num_programs(2) - 1)
    def _():
        val = accv[...] + bv_ref[...].astype(jnp.float32)
        gate = accg[...] + bg_ref[...].astype(jnp.float32)
        # exact (erf-based) GELU, matching torch.nn.functional.gelu default
        inv_sqrt2 = jnp.float32(1.0 / math.sqrt(2.0))
        gelu_gate = 0.5 * gate * (1.0 + jax.lax.erf(gate * inv_sqrt2))
        o_ref[...] = (val * gelu_gate).astype(o_ref.dtype)


def geglu(x, weight, bias, *, tm=256, tn=256, tk=512, compute_dtype=None):
    """GeGLU forward.

    x:      (..., dim_in)
    weight: (dim_in, 2*dim_out)   (PyTorch nn.Linear weight transposed)
    bias:   (2*dim_out,)
    compute_dtype: optional dtype (e.g. jnp.bfloat16) for the MXU operands;
                   accumulation stays in f32.
    returns (..., dim_out)
    """
    *lead, dim_in = x.shape
    two_dim_out = weight.shape[1]
    dim_out = two_dim_out // 2

    # Split the fused projection into val/gate halves in the wrapper (free in
    # XLA) so the kernel uses two natural N-tiled matmuls instead of lane-
    # slicing a double-width accumulator.
    w_val, w_gate = weight[:, :dim_out], weight[:, dim_out:]
    b_val, b_gate = bias[:dim_out], bias[dim_out:]

    M = 1
    for s in lead:
        M *= s
    x2 = x.reshape(M, dim_in)

    out_dtype = x.dtype
    if compute_dtype is not None:
        x2 = x2.astype(compute_dtype)
        w_val = w_val.astype(compute_dtype)
        w_gate = w_gate.astype(compute_dtype)

    # Adapt tile sizes to the problem; keep lane dims multiples of 128 and
    # sublane dims multiples of 8.
    tm = min(tm, _round_up(M, 8))
    tn = min(tn, _round_up(dim_out, 128))
    tk = min(tk, _round_up(dim_in, 128))

    Mp = _round_up(M, tm)
    Np = _round_up(dim_out, tn)
    Kp = _round_up(dim_in, tk)

    # Zero-pad to tile multiples: padded K contributes nothing to the dot,
    # padded M/N rows/cols are sliced off below.
    if (Mp, Kp) != (M, dim_in):
        x2 = jnp.pad(x2, ((0, Mp - M), (0, Kp - dim_in)))
    if (Kp, Np) != (dim_in, dim_out):
        w_val = jnp.pad(w_val, ((0, Kp - dim_in), (0, Np - dim_out)))
        w_gate = jnp.pad(w_gate, ((0, Kp - dim_in), (0, Np - dim_out)))
    if Np != dim_out:
        b_val = jnp.pad(b_val, (0, Np - dim_out))
        b_gate = jnp.pad(b_gate, (0, Np - dim_out))
    b_val = b_val.reshape(1, Np)
    b_gate = b_gate.reshape(1, Np)

    grid = (Mp // tm, Np // tn, Kp // tk)

    out = pl.pallas_call(
        _geglu_kernel,
        out_shape=jax.ShapeDtypeStruct((Mp, Np), out_dtype),
        grid_spec=pltpu.PrefetchScalarGridSpec(
            num_scalar_prefetch=0,
            grid=grid,
            in_specs=[
                pl.BlockSpec((tm, tk), lambda i, j, k: (i, k)),   # x
                pl.BlockSpec((tk, tn), lambda i, j, k: (k, j)),   # W_val
                pl.BlockSpec((tk, tn), lambda i, j, k: (k, j)),   # W_gate
                pl.BlockSpec((1, tn), lambda i, j, k: (0, j)),    # b_val
                pl.BlockSpec((1, tn), lambda i, j, k: (0, j)),    # b_gate
            ],
            out_specs=pl.BlockSpec((tm, tn), lambda i, j, k: (i, j)),
            scratch_shapes=[
                pltpu.VMEM((tm, tn), jnp.float32),  # val accumulator
                pltpu.VMEM((tm, tn), jnp.float32),  # gate accumulator
            ],
        ),
        compiler_params=pltpu.CompilerParams(
            # M and N are independent (parallel, megacore-shardable on v7x);
            # K is the reduction axis (innermost, "arbitrary").
            dimension_semantics=("parallel", "parallel", "arbitrary"),
            # Explicit budget that fits v7x's 64 MiB VMEM (and trivially
            # v5e/v6e's 128 MiB) while allowing double-buffered tiles.
            vmem_limit_bytes=48 * 1024 * 1024,
        ),
    )(x2, w_val, w_gate, b_val, b_gate)

    out = out[:M, :dim_out]
    return out.reshape(*lead, dim_out)


def _geglu_ref(x, weight, bias):
    h = jnp.einsum("...i,io->...o", x, weight) + bias
    dim_out = weight.shape[1] // 2
    val, gate = h[..., :dim_out], h[..., dim_out:]
    return val * jax.nn.gelu(gate, approximate=False)


if __name__ == "__main__":
    key = jax.random.PRNGKey(0)

    # --- case 1: the basic small shape from the module spec ---
    batch, seq, dim_in, dim_out = 2, 8, 32, 32
    kx, kw, kb, key = jax.random.split(key, 4)
    x = jax.random.normal(kx, (batch, seq, dim_in), dtype=jnp.float32)
    bound = 1.0 / math.sqrt(dim_in)
    weight = jax.random.uniform(kw, (dim_in, 2 * dim_out),
                                minval=-bound, maxval=bound, dtype=jnp.float32)
    bias = jax.random.uniform(kb, (2 * dim_out,),
                              minval=-bound, maxval=bound, dtype=jnp.float32)

    out = jax.block_until_ready(geglu(x, weight, bias))
    ref = _geglu_ref(x, weight, bias)
    assert out.shape == (batch, seq, dim_out)
    assert jnp.allclose(out, ref, atol=1e-5, rtol=1e-5), "mismatch vs reference (case 1)"

    # --- case 2: odd sizes exercising the padding path (no divisibility asserts) ---
    batch2, seq2, dim_in2, dim_out2 = 3, 5, 40, 24
    kx2, kw2, kb2, key = jax.random.split(key, 4)
    x2 = jax.random.normal(kx2, (batch2, seq2, dim_in2), dtype=jnp.float32)
    bound2 = 1.0 / math.sqrt(dim_in2)
    weight2 = jax.random.uniform(kw2, (dim_in2, 2 * dim_out2),
                                 minval=-bound2, maxval=bound2, dtype=jnp.float32)
    bias2 = jax.random.uniform(kb2, (2 * dim_out2,),
                               minval=-bound2, maxval=bound2, dtype=jnp.float32)

    out2 = jax.block_until_ready(geglu(x2, weight2, bias2))
    ref2 = _geglu_ref(x2, weight2, bias2)
    assert out2.shape == (batch2, seq2, dim_out2)
    assert jnp.allclose(out2, ref2, atol=1e-5, rtol=1e-5), "mismatch vs reference (case 2)"

    print("KERNEL_OK")
</pallas_src>

<mosaic_0001>
module attributes {stable_mosaic.version = 11 : i64} {
  func.func @_geglu_kernel(%arg0: i32, %arg1: i32, %arg2: i32, %arg3: memref<16x128xf32, #tpu.memory_space<vmem>>, %arg4: memref<128x128xf32, #tpu.memory_space<vmem>>, %arg5: memref<128x128xf32, #tpu.memory_space<vmem>>, %arg6: memref<1x128xf32, #tpu.memory_space<vmem>>, %arg7: memref<1x128xf32, #tpu.memory_space<vmem>>, %arg8: memref<16x128xf32, #tpu.memory_space<vmem>>, %arg9: memref<16x128xf32, #tpu.memory_space<vmem>>, %arg10: memref<16x128xf32, #tpu.memory_space<vmem>>) attributes {dimension_semantics = [#tpu.dimension_semantics<parallel>, #tpu.dimension_semantics<parallel>, #tpu.dimension_semantics<arbitrary>], iteration_bounds = array<i64: 1, 1, 1>, scalar_prefetch = 0 : i64, scratch_operands = 2 : i64, tpu.core_type = #tpu.core_type<tc>, window_params = [{transform_indices = @transform_0, window_bounds = array<i64: 16, 128>}, {transform_indices = @transform_1, window_bounds = array<i64: 128, 128>}, {transform_indices = @transform_2, window_bounds = array<i64: 128, 128>}, {transform_indices = @transform_3, window_bounds = array<i64: 1, 128>}, {transform_indices = @transform_4, window_bounds = array<i64: 1, 128>}, {transform_indices = @transform_5, window_bounds = array<i64: 16, 128>}]} {
    %c0_i32 = arith.constant 0 : i32
    %0 = arith.cmpi eq, %arg2, %c0_i32 : i32
    %1 = arith.extui %0 : i1 to i32
    %c0_i32_0 = arith.constant 0 : i32
    %2 = arith.cmpi ne, %1, %c0_i32_0 : i32
    scf.if %2 {
      %cst_17 = arith.constant 0.000000e+00 : f32
      %17 = vector.broadcast %cst_17 : f32 to vector<16x128xf32>
      %c0_18 = arith.constant 0 : index
      %c0_19 = arith.constant 0 : index
      %18 = vector.load %arg9[%c0_18, %c0_19] : memref<16x128xf32, #tpu.memory_space<vmem>>, vector<16x128xf32>
      tpu.vector_store %arg9[%c0_18, %c0_19], %17 {strides = array<i32>} : memref<16x128xf32, #tpu.memory_space<vmem>>, vector<16x128xf32>,
      %cst_20 = arith.constant 0.000000e+00 : f32
      %19 = vector.broadcast %cst_20 : f32 to vector<16x128xf32>
      %c0_21 = arith.constant 0 : index
      %c0_22 = arith.constant 0 : index
      %20 = vector.load %arg10[%c0_21, %c0_22] : memref<16x128xf32, #tpu.memory_space<vmem>>, vector<16x128xf32>
      tpu.vector_store %arg10[%c0_21, %c0_22], %19 {strides = array<i32>} : memref<16x128xf32, #tpu.memory_space<vmem>>, vector<16x128xf32>,
    } else {
    }
    %c0 = arith.constant 0 : index
    %c0_1 = arith.constant 0 : index
    %3 = vector.load %arg3[%c0, %c0_1] : memref<16x128xf32, #tpu.memory_space<vmem>>, vector<16x128xf32>
    %c0_2 = arith.constant 0 : index
    %c0_3 = arith.constant 0 : index
    %4 = vector.load %arg9[%c0_2, %c0_3] : memref<16x128xf32, #tpu.memory_space<vmem>>, vector<16x128xf32>
    %c0_4 = arith.constant 0 : index
    %c0_5 = arith.constant 0 : index
    %5 = vector.load %arg4[%c0_4, %c0_5] : memref<128x128xf32, #tpu.memory_space<vmem>>, vector<128x128xf32>
    %cst = arith.constant dense<0.000000e+00> : vector<16x128xf32>
    %6 = tpu.matmul %3, %5, %cst {dimension_numbers = #tpu.dot_dimension_numbers<[1], [0], [0], [1], [0, 0, 1, 1], [], []>} : vector<16x128xf32>, vector<128x128xf32>, vector<16x128xf32> -> vector<16x128xf32>
    %7 = arith.addf %4, %6 : vector<16x128xf32>
    %c0_6 = arith.constant 0 : index
    %c0_7 = arith.constant 0 : index
    %8 = vector.load %arg9[%c0_6, %c0_7] : memref<16x128xf32, #tpu.memory_space<vmem>>, vector<16x128xf32>
    tpu.vector_store %arg9[%c0_6, %c0_7], %7 {strides = array<i32>} : memref<16x128xf32, #tpu.memory_space<vmem>>, vector<16x128xf32>,
    %c0_8 = arith.constant 0 : index
    %c0_9 = arith.constant 0 : index
    %9 = vector.load %arg10[%c0_8, %c0_9] : memref<16x128xf32, #tpu.memory_space<vmem>>, vector<16x128xf32>
    %c0_10 = arith.constant 0 : index
    %c0_11 = arith.constant 0 : index
    %10 = vector.load %arg5[%c0_10, %c0_11] : memref<128x128xf32, #tpu.memory_space<vmem>>, vector<128x128xf32>
    %cst_12 = arith.constant dense<0.000000e+00> : vector<16x128xf32>
    %11 = tpu.matmul %3, %10, %cst_12 {dimension_numbers = #tpu.dot_dimension_numbers<[1], [0], [0], [1], [0, 0, 1, 1], [], []>} : vector<16x128xf32>, vector<128x128xf32>, vector<16x128xf32> -> vector<16x128xf32>
    %12 = arith.addf %9, %11 : vector<16x128xf32>
    %c0_13 = arith.constant 0 : index
    %c0_14 = arith.constant 0 : index
    %13 = vector.load %arg10[%c0_13, %c0_14] : memref<16x128xf32, #tpu.memory_space<vmem>>, vector<16x128xf32>
    tpu.vector_store %arg10[%c0_13, %c0_14], %12 {strides = array<i32>} : memref<16x128xf32, #tpu.memory_space<vmem>>, vector<16x128xf32>,
    %c0_i32_15 = arith.constant 0 : i32
    %14 = arith.cmpi eq, %arg2, %c0_i32_15 : i32
    %15 = arith.extui %14 : i1 to i32
    %c0_i32_16 = arith.constant 0 : i32
    %16 = arith.cmpi ne, %15, %c0_i32_16 : i32
    scf.if %16 {
      %c0_17 = arith.constant 0 : index
      %c0_18 = arith.constant 0 : index
      %17 = vector.load %arg9[%c0_17, %c0_18] : memref<16x128xf32, #tpu.memory_space<vmem>>, vector<16x128xf32>
      %c0_19 = arith.constant 0 : index
      %c0_20 = arith.constant 0 : index
      %18 = vector.load %arg6[%c0_19, %c0_20] : memref<1x128xf32, #tpu.memory_space<vmem>>, vector<1x128xf32>
      %19 = vector.broadcast %18 : vector<1x128xf32> to vector<16x128xf32>
      %20 = arith.addf %17, %19 : vector<16x128xf32>
      %c0_21 = arith.constant 0 : index
      %c0_22 = arith.constant 0 : index
      %21 = vector.load %arg10[%c0_21, %c0_22] : memref<16x128xf32, #tpu.memory_space<vmem>>, vector<16x128xf32>
      %c0_23 = arith.constant 0 : index
      %c0_24 = arith.constant 0 : index
      %22 = vector.load %arg7[%c0_23, %c0_24] : memref<1x128xf32, #tpu.memory_space<vmem>>, vector<1x128xf32>
      %23 = vector.broadcast %22 : vector<1x128xf32> to vector<16x128xf32>
      %24 = arith.addf %21, %23 : vector<16x128xf32>
      %cst_25 = arith.constant 5.000000e-01 : f32
      %25 = vector.broadcast %cst_25 : f32 to vector<16x128xf32>
      %26 = arith.mulf %25, %24 : vector<16x128xf32>
      %cst_26 = arith.constant 0.707106769 : f32
      %27 = vector.broadcast %cst_26 : f32 to vector<16x128xf32>
      %28 = arith.mulf %24, %27 : vector<16x128xf32>
      %29 = math.erf %28 : vector<16x128xf32>
      %cst_27 = arith.constant 1.000000e+00 : f32
      %30 = vector.broadcast %cst_27 : f32 to vector<16x128xf32>
      %31 = arith.addf %30, %29 : vector<16x128xf32>
      %32 = arith.mulf %26, %31 : vector<16x128xf32>
      %33 = arith.mulf %20, %32 : vector<16x128xf32>
      %c0_28 = arith.constant 0 : index
      %c0_29 = arith.constant 0 : index
      %34 = vector.load %arg8[%c0_28, %c0_29] : memref<16x128xf32, #tpu.memory_space<vmem>>, vector<16x128xf32>
      tpu.vector_store %arg8[%c0_28, %c0_29], %33 {strides = array<i32>} : memref<16x128xf32, #tpu.memory_space<vmem>>, vector<16x128xf32>,
    } else {
    }
    return
  }
  func.func @transform_0(%arg0: i32, %arg1: i32, %arg2: i32) -> (i32, i32) {
    %c0_i32 = arith.constant 0 : i32
    return %arg0, %arg2 : i32, i32
  }
  func.func @transform_1(%arg0: i32, %arg1: i32, %arg2: i32) -> (i32, i32) {
    %c0_i32 = arith.constant 0 : i32
    return %arg2, %arg1 : i32, i32
  }
  func.func @transform_2(%arg0: i32, %arg1: i32, %arg2: i32) -> (i32, i32) {
    %c0_i32 = arith.constant 0 : i32
    return %arg2, %arg1 : i32, i32
  }
  func.func @transform_3(%arg0: i32, %arg1: i32, %arg2: i32) -> (i32, i32) {
    %c0_i32 = arith.constant 0 : i32
    %c0_i32_0 = arith.constant 0 : i32
    return %c0_i32, %arg1 : i32, i32
  }
  func.func @transform_4(%arg0: i32, %arg1: i32, %arg2: i32) -> (i32, i32) {
    %c0_i32 = arith.constant 0 : i32
    %c0_i32_0 = arith.constant 0 : i32
    return %c0_i32, %arg1 : i32, i32
  }
  func.func @transform_5(%arg0: i32, %arg1: i32, %arg2: i32) -> (i32, i32) {
    %c0_i32 = arith.constant 0 : i32
    return %arg0, %arg1 : i32, i32
  }
}

</mosaic_0001>

<bundles_post_ra>
// kernel: tpu_custom_call.1
= control target key start
LH: loop header
LB: loop body
LE: loop exit
PB: predicated region body
PF: predicated region fallthrough
CT: control target
= control target key end

     0   :  { %10 = vsyncpa [#allocation5], 0  ;;  %s708_s0 = inlined_call_operand.hbm [shape: f32[16,128], index: 0, kind: input, shape index: {}]   ;;  %s709_s1 = inlined_call_operand.hbm [shape: f32[128,128], index: 1, kind: input, shape index: {}]   ;;  %s710_s2 = inlined_call_operand.hbm [shape: f32[128,128], index: 2, kind: input, shape index: {}]   ;;  %s711_s3 = inlined_call_operand.vmem [shape: f32[1,128], index: 3, kind: input, shape index: {}]   ;;  %s712_s4 = inlined_call_operand.vmem [shape: f32[1,128], index: 4, kind: input, shape index: {}]   ;;  %s713_s5 = inlined_call_operand.hbm [shape: f32[16,128], index: 5, kind: output, shape index: {}]  }
   0x1   :  { %11 = vsyncpa [#allocation8], 0 }
   0x2   :  { %12 = vsyncpa [#allocation6], 0  ;;  %s599_s18 = smov [#allocation7]   ;;  %s600_s20 = smov [#allocation4]  }
   0x3   :  { %s30_s19 = sshll.u32 %s599_s18, 4  ;;  %s18_s21 = sshll.u32 %s600_s20, 4  ;;  %s31_s19 = int_to_ptr.vmem [resolvable:$true] %s30_s19  ;;  %s635_s21 = int_to_ptr.vmem [resolvable:$true] %s18_s21 }
   0x4   :  { %s505_s24 = scalar_lea.hbm %s709_s1, 2048 }
   0x5   :  { %p506_p0 = scmp.ne.s32.totalorder %s709_s1, %s505_s24  ;;  %p509_p1 = scmp.lt.u32.totalorder %s505_s24, %s709_s1 }
   0x7   :  { %p511_p2 = pnand %p509_p1, %p506_p0 }
   0x9   :  { %514 = shalt.err (!%p511_p2)
}
   0xa   :  { %s515_s29 = scalar_lea.vmem %s31_s19, 2048  ;;  %p520_p4 = scmp.lt.s32.totalorder %s31_s19, %s31_s19 }
   0xb   :  { %p516_p3 = scmp.ne.s32.totalorder %s31_s19, %s515_s29  ;;  %p521_p5 = scmp.lt.s32.totalorder %s515_s29, %s515_s29 }
   0xd   :  { %p522_p6 = por %p521_p5, %p520_p4 }
   0xf   :  { %p523_p7 = pnand %p522_p6, %p516_p3 }
  0x11   :  { %526 = shalt.err (!%p523_p7)
}
  0x12   :  { %s601_s30 = smov 128   ;;  %s602_s6 = smov 8  }
  0x13   :  { %36 = dma.hbm_to_vmem [thread:$0]  %s709_s1, 2048, %s31_s19, [#allocation8], %s601_s30, %s601_s30, %s602_s6  }
  0x14   :  { %s527_s11 = scalar_lea.hbm %s708_s0, 256 }
  0x15   :  { %p528_p8 = scmp.ne.s32.totalorder %s708_s0, %s527_s11  ;;  %p531_p9 = scmp.lt.u32.totalorder %s527_s11, %s708_s0 }
  0x17   :  { %p533_p10 = pnand %p531_p9, %p528_p8 }
  0x19   :  { %536 = shalt.err (!%p533_p10)
}
  0x1a   :  { %s537_s16 = scalar_lea.vmem %s635_s21, 256  ;;  %p542_p12 = scmp.lt.s32.totalorder %s635_s21, %s635_s21 }
  0x1b   :  { %p538_p11 = scmp.ne.s32.totalorder %s635_s21, %s537_s16  ;;  %p543_p13 = scmp.lt.s32.totalorder %s537_s16, %s537_s16 }
  0x1d   :  { %p544_p0 = por %p543_p13, %p542_p12 }
  0x1f   :  { %p545_p1 = pnand %p544_p0, %p538_p11 }
  0x21   :  { %548 = shalt.err (!%p545_p1)
}
  0x22   :  { %24 = dma.hbm_to_vmem [thread:$0]  %s708_s0, 256, %s635_s21, [#allocation5], %s601_s30, %s601_s30, %s602_s6  }
  0x23   :  { %s603_s18 = smov [#allocation9]   ;;  %s549_s23 = scalar_lea.hbm %s710_s2, 2048 }
  0x24   :  { %s42_s19 = sshll.u32 %s603_s18, 4  ;;  %p550_p2 = scmp.ne.s32.totalorder %s710_s2, %s549_s23  ;;  %s43_s19 = int_to_ptr.vmem [resolvable:$true] %s42_s19 }
  0x25   :  { %p553_p3 = scmp.lt.u32.totalorder %s549_s23, %s710_s2 }
  0x27   :  { %p555_p4 = pnand %p553_p3, %p550_p2 }
  0x29   :  { %558 = shalt.err (!%p555_p4)
}
  0x2a   :  { %s559_s28 = scalar_lea.vmem %s43_s19, 2048  ;;  %p564_p6 = scmp.lt.s32.totalorder %s43_s19, %s43_s19 }
  0x2b   :  { %p560_p5 = scmp.ne.s32.totalorder %s43_s19, %s559_s28  ;;  %p565_p7 = scmp.lt.s32.totalorder %s559_s28, %s559_s28 }
  0x2d   :  { %p566_p8 = por %p565_p7, %p564_p6 }
  0x2f   :  { %p567_p9 = pnand %p566_p8, %p560_p5 }
  0x31   :  { %570 = shalt.err (!%p567_p9)
}
  0x32   :  { %48 = dma.hbm_to_vmem [thread:$0]  %s710_s2, 2048, %s43_s19, [#allocation8], %s601_s30, %s601_s30, %s602_s6  }
  0x33   :  { %593 = dma.done.wait [#allocation5], 256  }
  0x34   :  { %594 = vsyncadd [#allocation5], 4294967040 }
  0x35   :  { %595 = dma.done.wait [#allocation8], 4096  }
  0x36   :  { %596 = vsyncadd [#allocation8], 4294963200  ;;  %v171_v0 = vld [vmem:[#allocation9] sm:$0xff]  ;;  %v172_v1 = vld [vmem:[#allocation9 + $0x8] sm:$0xff] }
  0x37   :  { %v173_v2 = vld [vmem:[#allocation9 + $0x10] sm:$0xff]  ;;  %v463_v3 = vpack.c.bf16 %v172_v1, %v171_v0  ;;  %v174_v4 = vld [vmem:[#allocation9 + $0x18] sm:$0xff]  ;;  %v175_v6 = vld [vmem:[#allocation9 + $0x20] sm:$0xff] }
  0x38   :  { %v467_v5 = vpack.c.bf16 %v174_v4, %v173_v2  ;;  %v176_v7 = vld [vmem:[#allocation9 + $0x28] sm:$0xff]  ;;  %v74_v8 = vld [vmem:[#allocation7] sm:$0xff]  ;;  %v76_v11 = vld [vmem:[#allocation7 + $0x10] sm:$0xff] }
  0x39   :  { %464 = vmatprep.subr.bf16.mxu1 %v463_v3  ;;  %v75_v9 = vld [vmem:[#allocation7 + $0x8] sm:$0xff]  ;;  %v77_v12 = vld [vmem:[#allocation7 + $0x18] sm:$0xff]  ;;  %v471_v13 = vpack.c.bf16 %v176_v7, %v175_v6  ;;  %v78_v15 = vld [vmem:[#allocation7 + $0x20] sm:$0xff] }
  0x3a   :  { %466 = vmatpush3.bf16.msra.mxu1 %v463_v3  ;;  %v431_v10 = vpack.c.bf16 %v75_v9, %v74_v8  ;;  %v435_v14 = vpack.c.bf16 %v77_v12, %v76_v11  ;;  %v79_v16 = vld [vmem:[#allocation7 + $0x28] sm:$0xff]  ;;  %v177_v17 = vld [vmem:[#allocation9 + $0x30] sm:$0xff]  ;;  %v178_v18 = vld [vmem:[#allocation9 + $0x38] sm:$0xff] }
  0x3b   :  { %468 = vmatprep.subr.bf16.mxu1 %v467_v5  ;;  %v439_v19 = vpack.c.bf16 %v79_v16, %v78_v15  ;;  %v70_v20 = vld [vmem:[#allocation4] sm:$0xff]  ;;  %v475_v21 = vpack.c.bf16 %v178_v18, %v177_v17  ;;  %v81_v23 = vld [vmem:[#allocation7 + $0x38] sm:$0xff]  ;;  %v179_v24 = vld [vmem:[#allocation9 + $0x40] sm:$0xff] }
  0x3c   :  { %432 = vmatprep.subr.bf16.mxu0 %v431_v10  ;;  %v80_v22 = vld [vmem:[#allocation7 + $0x30] sm:$0xff]  ;;  %428 = vmatprep.mubr.f32.mxu1 %v70_v20  ;;  %v180_v25 = vld [vmem:[#allocation9 + $0x48] sm:$0xff]  ;;  %v82_v28 = vld [vmem:[#allocation7 + $0x40] sm:$0xff] }
  0x3d   :  { %434 = vmatpush3.bf16.msra.mxu0 %v431_v10  ;;  %393 = vmatprep.mubr.f32.mxu0 %v70_v20  ;;  %v443_v26 = vpack.c.bf16 %v81_v23, %v80_v22  ;;  %v479_v27 = vpack.c.bf16 %v180_v25, %v179_v24  ;;  %v83_v29 = vld [vmem:[#allocation7 + $0x48] sm:$0xff]  ;;  %v181_v30 = vld [vmem:[#allocation9 + $0x50] sm:$0xff]  ;;  %v182_v31 = vld [vmem:[#allocation9 + $0x58] sm:$0xff] }
  0x3e   :  { %470 = vmatpush3.bf16.msra.mxu1 %v467_v5  ;;  %436 = vmatprep.subr.bf16.mxu0 %v435_v14  ;;  %v447_v32 = vpack.c.bf16 %v83_v29, %v82_v28  ;;  %v483_v33 = vpack.c.bf16 %v182_v31, %v181_v30  ;;  %v84_v34 = vld [vmem:[#allocation7 + $0x50] sm:$0xff]  ;;  %v85_v35 = vld [vmem:[#allocation7 + $0x58] sm:$0xff]  ;;  %v183_v36 = vld [vmem:[#allocation9 + $0x60] sm:$0xff] }
  0x3f   :  { %472 = vmatprep.subr.bf16.mxu1 %v471_v13  ;;  %v184_v37 = vld [vmem:[#allocation9 + $0x68] sm:$0xff]  ;;  %v451_v38 = vpack.c.bf16 %v85_v35, %v84_v34  ;;  %v86_v40 = vld [vmem:[#allocation7 + $0x60] sm:$0xff]  ;;  %v185_v42 = vld [vmem:[#allocation9 + $0x70] sm:$0xff] }
  0x40   :  { %v487_v39 = vpack.c.bf16 %v184_v37, %v183_v36  ;;  %v87_v41 = vld [vmem:[#allocation7 + $0x68] sm:$0xff]  ;;  %v186_v43 = vld [vmem:[#allocation9 + $0x78] sm:$0xff]  ;;  %v88_v46 = vld [vmem:[#allocation7 + $0x70] sm:$0xff] }
  0x41   :  { %438 = vmatpush3.bf16.msra.mxu0 %v435_v14  ;;  %v455_v44 = vpack.c.bf16 %v87_v41, %v86_v40  ;;  %v491_v45 = vpack.c.bf16 %v186_v43, %v185_v42  ;;  %v89_v47 = vld [vmem:[#allocation7 + $0x78] sm:$0xff]  ;;  %v324_v50 = vld [vmem:[%s712_s4] ss:$0 sm:$0xff]  ;;  %s604_s4 = smov [#allocation10]  }
  0x42   :  { %474 = vmatpush3.bf16.msra.mxu1 %v471_v13  ;;  %440 = vmatprep.subr.bf16.mxu0 %v439_v19  ;;  %v459_v48 = vpack.c.bf16 %v89_v47, %v88_v46  ;;  %v71_v49 = vld [vmem:[#allocation4 + $0x8] sm:$0xff]  ;;  %v323_v59 = vld [vmem:[%s711_s3] ss:$0 sm:$0xff]  ;;  %s310_s9 = sshll.u32 %s604_s4, 4  ;;  %s311_s9 = int_to_ptr.vmem [resolvable:$true] %s310_s9 }
  0x43   :  { %476 = vmatprep.subr.bf16.mxu1 %v475_v21  ;;  %s571_s10 = scalar_lea.vmem %s311_s9, 256  ;;  %p576_p11 = scmp.lt.s32.totalorder %s311_s9, %s311_s9 }
  0x44   :  { %p572_p10 = scmp.ne.s32.totalorder %s311_s9, %s571_s10  ;;  %p577_p12 = scmp.lt.s32.totalorder %s571_s10, %s571_s10 }
  0x45   :  { %442 = vmatpush3.bf16.msra.mxu0 %v439_v19 }
  0x46   :  { %478 = vmatpush3.bf16.msra.mxu1 %v475_v21  ;;  %444 = vmatprep.subr.bf16.mxu0 %v443_v26  ;;  %p578_p13 = por %p577_p12, %p576_p11 }
  0x47   :  { %480 = vmatprep.subr.bf16.mxu1 %v479_v27 }
  0x48   :  { %p579_p0 = pnand %p578_p13, %p572_p10 }
  0x49   :  { %446 = vmatpush3.bf16.msra.mxu0 %v443_v26 }
  0x4a   :  { %482 = vmatpush3.bf16.msra.mxu1 %v479_v27  ;;  %448 = vmatprep.subr.bf16.mxu0 %v447_v32 }
  0x4b   :  { %484 = vmatprep.subr.bf16.mxu1 %v483_v33 }
  0x4d   :  { %450 = vmatpush3.bf16.msra.mxu0 %v447_v32 }
  0x4e   :  { %486 = vmatpush3.bf16.msra.mxu1 %v483_v33  ;;  %452 = vmatprep.subr.bf16.mxu0 %v451_v38 }
  0x4f   :  { %488 = vmatprep.subr.bf16.mxu1 %v487_v39 }
  0x51   :  { %454 = vmatpush3.bf16.msra.mxu0 %v451_v38 }
  0x52   :  { %490 = vmatpush3.bf16.msra.mxu1 %v487_v39  ;;  %456 = vmatprep.subr.bf16.mxu0 %v455_v44 }
  0x53   :  { %492 = vmatprep.subr.bf16.mxu1 %v491_v45 }
  0x55   :  { %458 = vmatpush3.bf16.msra.mxu0 %v455_v44 }
  0x56   :  { %494 = vmatpush3.bf16.msra.mxu1 %v491_v45  ;;  %460 = vmatprep.subr.bf16.mxu0 %v459_v48 }
  0x59   :  { %429 = vmatmul.mubr.f32.vlgmr.msra.gmra.mrb[0].mxu1 %v71_v49  ;;  %462 = vmatpush3.bf16.msra.mxu0 %v459_v48 }
  0x5c   :  { %394 = vmatmul.mubr.f32.vlgmr.msra.gmra.mrb[0].mxu0 %v71_v49 }
 0x12c   :  { %v430_v51 = vpop.f32.mrb[0].mxu1 }
 0x12d   :  { %v290_v52 = vadd.f32 %v430_v51, %v324_v50  ;;  %v253_v53 = vpop.f32.mrb[1].mxu1 }
 0x12e   :  { %v289_v54 = vadd.f32 %v324_v50, %v253_v53 }
 0x12f   :  { %v294_v55 = vmul.f32 0.70710677, %v290_v52  ;;  %v395_v56 = vpop.f32.mrb[0].mxu0  ;;  %v292_v62 = vmul.f32 0.5, %v290_v52 }
 0x130   :  { %v293_v57 = vmul.f32 0.70710677, %v289_v54  ;;  %v156_v58 = vpop.f32.mrb[1].mxu0  ;;  %v279_v0 = vadd.f32 %v395_v56, %v323_v59  ;;  %v291_v1 = vmul.f32 0.5, %v289_v54 }
 0x131   :  { %501 = verf.f32 %v294_v55  ;;  %v278_v3 = vadd.f32 %v323_v59, %v156_v58 }
 0x132   :  { %503 = verf.f32 %v293_v57 }
 0x13b   :  { %v502_v60 = vpop.eup %501 }
 0x13c   :  { %v504_v61 = vpop.eup %503  ;;  %v298_v63 = vadd.f32 1.0, %v502_v60 }
 0x13d   :  { %v297_v2 = vadd.f32 1.0, %v504_v61 }
 0x13e   :  { %v300_v4 = vmul.f32 %v298_v63, %v292_v62 }
 0x13f   :  { %v299_v5 = vmul.f32 %v297_v2, %v291_v1 }
 0x140   :  { %v302_v6 = vmul.f32 %v300_v4, %v279_v0 }
 0x141   :  { %v301_v7 = vmul.f32 %v299_v5, %v278_v3 }
 0x142   :  { %304 = vst [vmem:[#allocation10 + $0x8] sm:$0xff] %v302_v6 }
 0x143   :  { %303 = vst [vmem:[#allocation10] sm:$0xff] %v301_v7 }
 0x144   :  { %582 = shalt.err (!%p579_p0)
}
 0x145   :  { %s583_s12 = scalar_lea.hbm %s713_s5, 256 }
 0x146   :  { %p584_p1 = scmp.ne.s32.totalorder %s713_s5, %s583_s12  ;;  %p587_p2 = scmp.lt.u32.totalorder %s583_s12, %s713_s5 }
 0x148   :  { %p589_p3 = pnand %p587_p2, %p584_p1 }
 0x14a   :  { %592 = shalt.err (!%p589_p3)
}
 0x14b   :  { %316 = dma.vmem_to_hbm [thread:$0]  %s311_s9, 256, %s713_s5, [#allocation6], %s601_s30, %s601_s30, %s602_s6  }
 0x14c   :  { %597 = dma.done.wait [#allocation6], 256  }
 0x14d   :  { %598 = vsyncadd [#allocation6], 4294967040 }
 0x14e   :  { %320 = vsyncpa [#allocation5], 1 }
 0x14f   :  { %321 = vsyncpa [#allocation8], 1 }
 0x150   :  { %322 = vsyncpa [#allocation6], 1 }

</bundles_post_ra>
